<compile_context>
chip_gen: v7x
topology: tpu7x:2x2x1
jax: 0.10.0
libtpu: 0.0.40
codegen_flags: <defaults>
</compile_context>

<pallas_src>
import functools

import jax
import jax.numpy as jnp
from jax.experimental import pallas as pl
from jax.experimental.pallas import tpu as pltpu


LANE = 128
SUBLANE = 8


def _round_up(x, m):
    return ((x + m - 1) // m) * m


# ----------------------------- Fused Pallas kernel --------------------------

def _fused_hypernet_kernel(sizes, c_sum, x_ref, w1_ref, w2_ref, wh_ref, bh_ref,
                           out_ref):
    """x:[tb,Din] w1:[Din,H] w2:[H,E] wh:[E,C_pad] bh:[1,C_pad] -> out:[tb,C_pad]."""
    # EncNet: relu(relu(x @ W1) @ W2). bf16 MXU operands, f32 accumulation.
    xb = x_ref[...].astype(jnp.bfloat16)
    h1 = jnp.maximum(
        jnp.dot(xb, w1_ref[...], preferred_element_type=jnp.float32), 0.0)
    h2 = jnp.maximum(
        jnp.dot(h1.astype(jnp.bfloat16), w2_ref[...],
                preferred_element_type=jnp.float32), 0.0)

    # All heads in one lane-dense matmul; bias broadcast once per tile.
    logits = jnp.dot(h2.astype(jnp.bfloat16), wh_ref[...],
                     preferred_element_type=jnp.float32)
    logits = logits + bh_ref[...]

    # Merged per-head softmax: ONE exp over the whole 128-lane slab.
    lane = jax.lax.broadcasted_iota(jnp.int32, logits.shape, dimension=1)
    # Per-lane max slab, initialized to logits so padded lanes give exp(0)=1
    # (finite); padded lanes never enter any head's denominator and are zeroed
    # on the final write.
    m_slab = logits
    masks = []
    start = 0
    for c in sizes:                       # static unroll, len(sizes) is tiny
        mask = (lane >= start) & (lane < start + c)
        masks.append(mask)
        m = jnp.max(jnp.where(mask, logits, -jnp.inf), axis=-1, keepdims=True)
        m_slab = jnp.where(mask, m, m_slab)
        start += c
    # NOTE: keep jnp.where (a select) above; masked-out lanes hold -inf and a
    # multiply-by-mask "optimization" would generate NaNs.
    e = jnp.exp(logits - m_slab)          # single EUP pass, <= 1 on valid lanes

    # Per-head denominators merged into one per-lane denominator slab.
    denom = jnp.ones_like(logits)
    for mask in masks:
        d = jnp.sum(jnp.where(mask, e, 0.0), axis=-1, keepdims=True)
        denom = jnp.where(mask, d, denom)

    probs = e / denom                     # exact divide (plenty of VPU/EUP slack)
    out_ref[...] = jnp.where(lane < c_sum, probs, 0.0).astype(out_ref.dtype)


# ------------------------------ Parameter glue ------------------------------

def _spectral_normalize(w, key, n_iter=3, eps=1e-12):
    """PyTorch-style spectral_norm: W / sigma, sigma via power iteration. w:[out,in]."""
    out_dim, in_dim = w.shape
    u = jax.random.normal(key, (out_dim,), dtype=w.dtype)
    u = u / (jnp.linalg.norm(u) + eps)
    v = jnp.zeros((in_dim,), dtype=w.dtype)
    for _ in range(n_iter):
        v = w.T @ u
        v = v / (jnp.linalg.norm(v) + eps)
        u = w @ v
        u = u / (jnp.linalg.norm(u) + eps)
    sigma = u @ (w @ v)
    return w / sigma


def _linear_init(key, out_dim, in_dim, with_bias):
    """Deterministic PyTorch-Linear-like init (uniform in +/- 1/sqrt(in))."""
    kw, kb = jax.random.split(key)
    bound = 1.0 / jnp.sqrt(jnp.float32(in_dim))
    w = jax.random.uniform(kw, (out_dim, in_dim), jnp.float32, -bound, bound)
    if with_bias:
        b = jax.random.uniform(kb, (out_dim,), jnp.float32, -bound, bound)
        return w, b
    return w, None


def init_hypernet_params(key, input_dim, sizes, hid_dim=64, enc_out=32):
    """All layout work (transpose, concat heads, 128-lane padding, bf16) done here, once."""
    k1, k2, k3, k4, kh = jax.random.split(key, 5)
    w1, _ = _linear_init(k1, hid_dim, input_dim, with_bias=False)
    w2, _ = _linear_init(k2, enc_out, hid_dim, with_bias=False)
    w1_sn = _spectral_normalize(w1, k3)   # spectral norm = init-time param setup
    w2_sn = _spectral_normalize(w2, k4)

    head_keys = jax.random.split(kh, len(sizes))
    c_sum = sum(sizes)
    c_pad = max(LANE, _round_up(c_sum, LANE))
    wh = jnp.zeros((enc_out, c_pad), jnp.float32)
    bh = jnp.zeros((1, c_pad), jnp.float32)
    start = 0
    for num_cate, hk in zip(sizes, head_keys):
        wo, bo = _linear_init(hk, num_cate, enc_out, with_bias=True)
        wh = wh.at[:, start:start + num_cate].set(wo.T)
        bh = bh.at[:, start:start + num_cate].set(bo.reshape(1, -1))
        start += num_cate

    return {
        "w1_t": w1_sn.T.astype(jnp.bfloat16),   # [input_dim, hid_dim] pre-transposed
        "w2_t": w2_sn.T.astype(jnp.bfloat16),   # [hid_dim, enc_out]
        "wh": wh.astype(jnp.bfloat16),          # [enc_out, c_pad] all heads, lane-padded
        "bh": bh,                               # [1, c_pad]  (f32, added post-MXU)
        "sizes": tuple(sizes),
    }


# ------------------------------- Forward pass --------------------------------

def hypernet_forward(params, encoding):
    """encoding: [B, input_dim] -> list of [B, num_cate] probability tensors (f32)."""
    x = encoding.astype(jnp.float32)
    B, d_in = x.shape
    sizes = params["sizes"]
    w1_t, w2_t = params["w1_t"], params["w2_t"]
    wh, bh = params["wh"], params["bh"]
    hid, enc_out, c_pad = w1_t.shape[1], w2_t.shape[1], wh.shape[1]
    c_sum = sum(sizes)

    # Batch tile: single tile for small B; for large B keep >= 2 grid steps so
    # the "parallel" batch axis shards across v7x's two TensorCores, with a
    # 2048-row cap that amortizes per-step overhead yet keeps double-buffered
    # bf16 tiles + f32 intermediates well under v5e's 16 MiB scoped-VMEM default.
    if B <= 512:
        tile_b = _round_up(max(B, 1), SUBLANE)
    else:
        tile_b = min(2048, _round_up((B + 1) // 2, SUBLANE))
    grid = (pl.cdiv(B, tile_b),)   # ragged last block handled by Pallas (no pad)

    kernel = functools.partial(_fused_hypernet_kernel, sizes, c_sum)
    out = pl.pallas_call(
        kernel,
        out_shape=jax.ShapeDtypeStruct((B, c_pad), jnp.bfloat16),
        grid_spec=pltpu.PrefetchScalarGridSpec(
            num_scalar_prefetch=0,
            grid=grid,
            in_specs=[
                pl.BlockSpec((tile_b, d_in), lambda i: (i, 0)),
                pl.BlockSpec((d_in, hid), lambda i: (0, 0)),
                pl.BlockSpec((hid, enc_out), lambda i: (0, 0)),
                pl.BlockSpec((enc_out, c_pad), lambda i: (0, 0)),
                pl.BlockSpec((1, c_pad), lambda i: (0, 0)),
            ],
            out_specs=pl.BlockSpec((tile_b, c_pad), lambda i: (i, 0)),
        ),
        compiler_params=pltpu.CompilerParams(
            dimension_semantics=("parallel",)),
    )(x, w1_t, w2_t, wh, bh)

    # Per-head views (module semantics: list of [B, num_cate] f32 tensors).
    # Slices are narrow (c lanes) and fused with the f32 upcast by XLA.
    probs, start = [], 0
    for c in sizes:
        probs.append(out[:, start:start + c].astype(jnp.float32))
        start += c
    return probs


# ----------------------------------- Main ------------------------------------

if __name__ == "__main__":
    key = jax.random.PRNGKey(0)
    k_param, k_x = jax.random.split(key)

    input_dim = 16
    sizes = [3, 5, 4]       # categorical arm sizes per hyperparameter
    n_clients = 8           # batch dimension

    params = init_hypernet_params(k_param, input_dim, sizes)
    encoding = jax.random.normal(k_x, (n_clients, input_dim), dtype=jnp.float32)

    probs = hypernet_forward(params, encoding)
    probs = [jax.block_until_ready(p) for p in probs]

    # Pure-JAX reference with the same bf16-operand / f32-accumulate numerics.
    def _ref(params, x):
        xb = x.astype(jnp.bfloat16)
        h = jnp.maximum(jnp.dot(xb, params["w1_t"],
                                preferred_element_type=jnp.float32), 0.0)
        h = jnp.maximum(jnp.dot(h.astype(jnp.bfloat16), params["w2_t"],
                                preferred_element_type=jnp.float32), 0.0)
        hb = h.astype(jnp.bfloat16)
        outs, start = [], 0
        for c in params["sizes"]:
            logits = jnp.dot(hb, params["wh"][:, start:start + c],
                             preferred_element_type=jnp.float32)
            logits = logits + params["bh"][:, start:start + c]
            outs.append(jax.nn.softmax(logits, axis=-1))
            start += c
        return outs

    refs = _ref(params, encoding)
    for p, r, s in zip(probs, refs, sizes):
        assert p.shape == (n_clients, s)
        # bf16 output writeback -> ~4e-3 rounding; 1e-2 tolerance on sanity checks
        assert jnp.allclose(jnp.sum(p, axis=-1), 1.0, atol=1e-2)
        assert jnp.max(jnp.abs(p - r)) < 1e-2

    print("KERNEL_OK")
</pallas_src>

<mosaic_0001>
module attributes {stable_mosaic.version = 11 : i64} {
  func.func @_fused_hypernet_kernel(%arg0: i32, %arg1: memref<8x16xf32, #tpu.memory_space<vmem>>, %arg2: memref<16x64xbf16, #tpu.memory_space<vmem>>, %arg3: memref<64x32xbf16, #tpu.memory_space<vmem>>, %arg4: memref<32x128xbf16, #tpu.memory_space<vmem>>, %arg5: memref<1x128xf32, #tpu.memory_space<vmem>>, %arg6: memref<8x128xbf16, #tpu.memory_space<vmem>>) attributes {dimension_semantics = [#tpu.dimension_semantics<parallel>], iteration_bounds = array<i64: 1>, scalar_prefetch = 0 : i64, scratch_operands = 0 : i64, tpu.core_type = #tpu.core_type<tc>, window_params = [{transform_indices = @transform_0, window_bounds = array<i64: 8, 16>}, {pipeline_mode = #tpu.pipeline_mode<synchronous>, transform_indices = @transform_1, window_bounds = array<i64: 16, 64>}, {pipeline_mode = #tpu.pipeline_mode<synchronous>, transform_indices = @transform_2, window_bounds = array<i64: 64, 32>}, {pipeline_mode = #tpu.pipeline_mode<synchronous>, transform_indices = @transform_3, window_bounds = array<i64: 32, 128>}, {pipeline_mode = #tpu.pipeline_mode<synchronous>, transform_indices = @transform_4, window_bounds = array<i64: 1, 128>}, {transform_indices = @transform_5, window_bounds = array<i64: 8, 128>}]} {
    %c0 = arith.constant 0 : index
    %c0_0 = arith.constant 0 : index
    %0 = vector.load %arg1[%c0, %c0_0] : memref<8x16xf32, #tpu.memory_space<vmem>>, vector<8x16xf32>
    %1 = arith.truncf %0 : vector<8x16xf32> to vector<8x16xbf16>
    %c0_1 = arith.constant 0 : index
    %c0_2 = arith.constant 0 : index
    %2 = vector.load %arg2[%c0_1, %c0_2] : memref<16x64xbf16, #tpu.memory_space<vmem>>, vector<16x64xbf16>
    %cst = arith.constant dense<0.000000e+00> : vector<8x64xf32>
    %3 = tpu.matmul %1, %2, %cst {dimension_numbers = #tpu.dot_dimension_numbers<[1], [0], [0], [1], [0, 0, 1, 1], [], []>} : vector<8x16xbf16>, vector<16x64xbf16>, vector<8x64xf32> -> vector<8x64xf32>
    %cst_3 = arith.constant 0.000000e+00 : f32
    %4 = vector.broadcast %cst_3 : f32 to vector<8x64xf32>
    %5 = arith.maximumf %3, %4 : vector<8x64xf32>
    %6 = arith.truncf %5 : vector<8x64xf32> to vector<8x64xbf16>
    %c0_4 = arith.constant 0 : index
    %c0_5 = arith.constant 0 : index
    %7 = vector.load %arg3[%c0_4, %c0_5] : memref<64x32xbf16, #tpu.memory_space<vmem>>, vector<64x32xbf16>
    %cst_6 = arith.constant dense<0.000000e+00> : vector<8x32xf32>
    %8 = tpu.matmul %6, %7, %cst_6 {dimension_numbers = #tpu.dot_dimension_numbers<[1], [0], [0], [1], [0, 0, 1, 1], [], []>} : vector<8x64xbf16>, vector<64x32xbf16>, vector<8x32xf32> -> vector<8x32xf32>
    %cst_7 = arith.constant 0.000000e+00 : f32
    %9 = vector.broadcast %cst_7 : f32 to vector<8x32xf32>
    %10 = arith.maximumf %8, %9 : vector<8x32xf32>
    %11 = arith.truncf %10 : vector<8x32xf32> to vector<8x32xbf16>
    %c0_8 = arith.constant 0 : index
    %c0_9 = arith.constant 0 : index
    %12 = vector.load %arg4[%c0_8, %c0_9] : memref<32x128xbf16, #tpu.memory_space<vmem>>, vector<32x128xbf16>
    %cst_10 = arith.constant dense<0.000000e+00> : vector<8x128xf32>
    %13 = tpu.matmul %11, %12, %cst_10 {dimension_numbers = #tpu.dot_dimension_numbers<[1], [0], [0], [1], [0, 0, 1, 1], [], []>} : vector<8x32xbf16>, vector<32x128xbf16>, vector<8x128xf32> -> vector<8x128xf32>
    %c0_11 = arith.constant 0 : index
    %c0_12 = arith.constant 0 : index
    %14 = vector.load %arg5[%c0_11, %c0_12] : memref<1x128xf32, #tpu.memory_space<vmem>>, vector<1x128xf32>
    %15 = vector.broadcast %14 : vector<1x128xf32> to vector<8x128xf32>
    %16 = arith.addf %13, %15 : vector<8x128xf32>
    %17 = tpu.iota {dimensions = array<i32: 1>} : vector<8x128xi32>
    %c0_i32 = arith.constant 0 : i32
    %18 = vector.broadcast %c0_i32 : i32 to vector<8x128xi32>
    %19 = arith.cmpi sge, %17, %18 : vector<8x128xi32>
    %c3_i32 = arith.constant 3 : i32
    %20 = vector.broadcast %c3_i32 : i32 to vector<8x128xi32>
    %21 = arith.cmpi slt, %17, %20 : vector<8x128xi32>
    %22 = arith.andi %19, %21 : vector<8x128xi1>
    %cst_13 = arith.constant 0xFF800000 : f32
    %23 = vector.broadcast %cst_13 : f32 to vector<8x128xf32>
    %24 = arith.select %22, %16, %23 : vector<8x128xi1>, vector<8x128xf32>
    %cst_14 = arith.constant dense<0xFF800000> : vector<8xf32>
    %25 = vector.multi_reduction <maximumf>, %24, %cst_14 [1] : vector<8x128xf32> to vector<8xf32>
    %26 = vector.shape_cast %25 : vector<8xf32> to vector<8x1xf32>
    %27 = vector.shape_cast %26 : vector<8x1xf32> to vector<8x1xf32>
    %28 = vector.broadcast %27 : vector<8x1xf32> to vector<8x128xf32>
    %29 = arith.select %22, %28, %16 : vector<8x128xi1>, vector<8x128xf32>
    %c3_i32_15 = arith.constant 3 : i32
    %30 = vector.broadcast %c3_i32_15 : i32 to vector<8x128xi32>
    %31 = arith.cmpi sge, %17, %30 : vector<8x128xi32>
    %c8_i32 = arith.constant 8 : i32
    %32 = vector.broadcast %c8_i32 : i32 to vector<8x128xi32>
    %33 = arith.cmpi slt, %17, %32 : vector<8x128xi32>
    %34 = arith.andi %31, %33 : vector<8x128xi1>
    %cst_16 = arith.constant 0xFF800000 : f32
    %35 = vector.broadcast %cst_16 : f32 to vector<8x128xf32>
    %36 = arith.select %34, %16, %35 : vector<8x128xi1>, vector<8x128xf32>
    %cst_17 = arith.constant dense<0xFF800000> : vector<8xf32>
    %37 = vector.multi_reduction <maximumf>, %36, %cst_17 [1] : vector<8x128xf32> to vector<8xf32>
    %38 = vector.shape_cast %37 : vector<8xf32> to vector<8x1xf32>
    %39 = vector.shape_cast %38 : vector<8x1xf32> to vector<8x1xf32>
    %40 = vector.broadcast %39 : vector<8x1xf32> to vector<8x128xf32>
    %41 = arith.select %34, %40, %29 : vector<8x128xi1>, vector<8x128xf32>
    %c8_i32_18 = arith.constant 8 : i32
    %42 = vector.broadcast %c8_i32_18 : i32 to vector<8x128xi32>
    %43 = arith.cmpi sge, %17, %42 : vector<8x128xi32>
    %c12_i32 = arith.constant 12 : i32
    %44 = vector.broadcast %c12_i32 : i32 to vector<8x128xi32>
    %45 = arith.cmpi slt, %17, %44 : vector<8x128xi32>
    %46 = arith.andi %43, %45 : vector<8x128xi1>
    %cst_19 = arith.constant 0xFF800000 : f32
    %47 = vector.broadcast %cst_19 : f32 to vector<8x128xf32>
    %48 = arith.select %46, %16, %47 : vector<8x128xi1>, vector<8x128xf32>
    %cst_20 = arith.constant dense<0xFF800000> : vector<8xf32>
    %49 = vector.multi_reduction <maximumf>, %48, %cst_20 [1] : vector<8x128xf32> to vector<8xf32>
    %50 = vector.shape_cast %49 : vector<8xf32> to vector<8x1xf32>
    %51 = vector.shape_cast %50 : vector<8x1xf32> to vector<8x1xf32>
    %52 = vector.broadcast %51 : vector<8x1xf32> to vector<8x128xf32>
    %53 = arith.select %46, %52, %41 : vector<8x128xi1>, vector<8x128xf32>
    %54 = arith.subf %16, %53 : vector<8x128xf32>
    %55 = math.exp %54 : vector<8x128xf32>
    %cst_21 = arith.constant 1.000000e+00 : f32
    %56 = vector.broadcast %cst_21 : f32 to vector<8x128xf32>
    %cst_22 = arith.constant 0.000000e+00 : f32
    %57 = vector.broadcast %cst_22 : f32 to vector<8x128xf32>
    %58 = arith.select %22, %55, %57 : vector<8x128xi1>, vector<8x128xf32>
    %cst_23 = arith.constant dense<0.000000e+00> : vector<8xf32>
    %59 = vector.multi_reduction <add>, %58, %cst_23 [1] : vector<8x128xf32> to vector<8xf32>
    %60 = vector.shape_cast %59 : vector<8xf32> to vector<8x1xf32>
    %61 = vector.shape_cast %60 : vector<8x1xf32> to vector<8x1xf32>
    %62 = vector.broadcast %61 : vector<8x1xf32> to vector<8x128xf32>
    %63 = arith.select %22, %62, %56 : vector<8x128xi1>, vector<8x128xf32>
    %cst_24 = arith.constant 0.000000e+00 : f32
    %64 = vector.broadcast %cst_24 : f32 to vector<8x128xf32>
    %65 = arith.select %34, %55, %64 : vector<8x128xi1>, vector<8x128xf32>
    %cst_25 = arith.constant dense<0.000000e+00> : vector<8xf32>
    %66 = vector.multi_reduction <add>, %65, %cst_25 [1] : vector<8x128xf32> to vector<8xf32>
    %67 = vector.shape_cast %66 : vector<8xf32> to vector<8x1xf32>
    %68 = vector.shape_cast %67 : vector<8x1xf32> to vector<8x1xf32>
    %69 = vector.broadcast %68 : vector<8x1xf32> to vector<8x128xf32>
    %70 = arith.select %34, %69, %63 : vector<8x128xi1>, vector<8x128xf32>
    %cst_26 = arith.constant 0.000000e+00 : f32
    %71 = vector.broadcast %cst_26 : f32 to vector<8x128xf32>
    %72 = arith.select %46, %55, %71 : vector<8x128xi1>, vector<8x128xf32>
    %cst_27 = arith.constant dense<0.000000e+00> : vector<8xf32>
    %73 = vector.multi_reduction <add>, %72, %cst_27 [1] : vector<8x128xf32> to vector<8xf32>
    %74 = vector.shape_cast %73 : vector<8xf32> to vector<8x1xf32>
    %75 = vector.shape_cast %74 : vector<8x1xf32> to vector<8x1xf32>
    %76 = vector.broadcast %75 : vector<8x1xf32> to vector<8x128xf32>
    %77 = arith.select %46, %76, %70 : vector<8x128xi1>, vector<8x128xf32>
    %78 = arith.divf %55, %77 : vector<8x128xf32>
    %c12_i32_28 = arith.constant 12 : i32
    %79 = vector.broadcast %c12_i32_28 : i32 to vector<8x128xi32>
    %80 = arith.cmpi slt, %17, %79 : vector<8x128xi32>
    %cst_29 = arith.constant 0.000000e+00 : f32
    %81 = vector.broadcast %cst_29 : f32 to vector<8x128xf32>
    %82 = arith.select %80, %78, %81 : vector<8x128xi1>, vector<8x128xf32>
    %83 = arith.truncf %82 : vector<8x128xf32> to vector<8x128xbf16>
    %c0_30 = arith.constant 0 : index
    %c0_31 = arith.constant 0 : index
    %84 = vector.load %arg6[%c0_30, %c0_31] : memref<8x128xbf16, #tpu.memory_space<vmem>>, vector<8x128xbf16>
    tpu.vector_store %arg6[%c0_30, %c0_31], %83 {strides = array<i32>} : memref<8x128xbf16, #tpu.memory_space<vmem>>, vector<8x128xbf16>,
    return
  }
  func.func @transform_0(%arg0: i32) -> (i32, i32) {
    %c0_i32 = arith.constant 0 : i32
    %c0_i32_0 = arith.constant 0 : i32
    return %arg0, %c0_i32 : i32, i32
  }
  func.func @transform_1(%arg0: i32) -> (i32, i32) {
    %c0_i32 = arith.constant 0 : i32
    %c0_i32_0 = arith.constant 0 : i32
    %c0_i32_1 = arith.constant 0 : i32
    return %c0_i32, %c0_i32_0 : i32, i32
  }
  func.func @transform_2(%arg0: i32) -> (i32, i32) {
    %c0_i32 = arith.constant 0 : i32
    %c0_i32_0 = arith.constant 0 : i32
    %c0_i32_1 = arith.constant 0 : i32
    return %c0_i32, %c0_i32_0 : i32, i32
  }
  func.func @transform_3(%arg0: i32) -> (i32, i32) {
    %c0_i32 = arith.constant 0 : i32
    %c0_i32_0 = arith.constant 0 : i32
    %c0_i32_1 = arith.constant 0 : i32
    return %c0_i32, %c0_i32_0 : i32, i32
  }
  func.func @transform_4(%arg0: i32) -> (i32, i32) {
    %c0_i32 = arith.constant 0 : i32
    %c0_i32_0 = arith.constant 0 : i32
    %c0_i32_1 = arith.constant 0 : i32
    return %c0_i32, %c0_i32_0 : i32, i32
  }
  func.func @transform_5(%arg0: i32) -> (i32, i32) {
    %c0_i32 = arith.constant 0 : i32
    %c0_i32_0 = arith.constant 0 : i32
    return %arg0, %c0_i32 : i32, i32
  }
}

</mosaic_0001>

<bundles_post_ra>
// kernel: tpu_custom_call.1
= control target key start
LH: loop header
LB: loop body
LE: loop exit
PB: predicated region body
PF: predicated region fallthrough
CT: control target
= control target key end

     0   :  { %v365_v1 = vmov 0.0   ;;  %vm32_vm0 = vcmask 130048   ;;  %vm366_vm1 = vmmov 0   ;;  %s467_s0 = inlined_call_operand.vmem [shape: f32[8,16], index: 0, kind: input, shape index: {}]   ;;  %s468_s1 = inlined_call_operand.vmem [shape: bf16[16,64], index: 1, kind: input, shape index: {}]   ;;  %s469_s2 = inlined_call_operand.vmem [shape: bf16[64,32], index: 2, kind: input, shape index: {}]   ;;  %s470_s3 = inlined_call_operand.vmem [shape: bf16[32,128], index: 3, kind: input, shape index: {}]   ;;  %s471_s4 = inlined_call_operand.vmem [shape: f32[1,128], index: 4, kind: input, shape index: {}]   ;;  %s472_s5 = inlined_call_operand.hbm [shape: bf16[8,128], index: 5, kind: output, shape index: {}]  }
   0x1   :  { %v330_v0 = vld [vmem:[%s468_s1] sm:$0xff]   ;;  %301 = vmatprep.subr.bf16.mxu0 %v365_v1  ;;  %307 = vmatprep.subr.bf16.mxu1 %v365_v1  ;;  %v332_v5 = vld [vmem:[%s469_s2 + $0x8] sm:$0xff]  }
   0x2   :  { %v22_v2 = vld [vmem:[%s467_s0] sm:$0xff]  ;;  %302 = vmatpush3.bf16.msra.mxu0 %v330_v0  ;;  %303 = vmatprep.mubr.msk.bf16.mxu0 %vm366_vm1, %v365_v1 }
   0x3   :  { %v331_v3 = vld [vmem:[%s469_s2] sm:$0xff]   ;;  %v23_v4 = vpack.c.bf16 %v22_v2, %v22_v2  ;;  %315 = vmatprep.mubr.msk.bf16.mxu1 %vm366_vm1, %v365_v1  ;;  %319 = vmatprep.subr.bf16.mxu0 %v365_v1 }
   0x4   :  { %308 = vmatpush3.bf16.msra.mxu1 %v331_v3 }
   0x5   :  { %309 = vmatprep.subr.bf16.mxu1 %v365_v1  ;;  %304 = vmatmul.mubr.msk.bf16.vlgmr.msra.gmra.mrb[0].mxu0 %vm32_vm0, %v23_v4 }
   0x6   :  { %323 = vmatprep.mubr.msk.bf16.mxu0 %vm366_vm1, %v365_v1 }
   0x7   :  { %10 = vsyncpa [#allocation3], 0  ;;  %v333_v6 = vld [vmem:[%s469_s2 + $0x10] sm:$0xff]   ;;  %v334_v7 = vld [vmem:[%s469_s2 + $0x18] sm:$0xff]   ;;  %vm110_vm2 = vcmask 523264   ;;  %vm179_vm3 = vcmask 261120   ;;  %v223_v22 = vlaneseq }
   0x8   :  { %310 = vmatpush3.bf16.msra.mxu1 %v332_v5  ;;  %v335_v8 = vld [vmem:[%s470_s3] sm:$0xff]   ;;  %v336_v15 = vld [vmem:[%s470_s3 + $0x8] sm:$0xff]   ;;  %s367_s3 = smov [#allocation2]  }
   0x9   :  { %311 = vmatprep.subr.bf16.mxu1 %v365_v1  ;;  %320 = vmatpush3.bf16.msra.mxu0 %v335_v8  ;;  %v224_v23 = vand.u32 127, %v223_v22  ;;  %v287_v24 = vld [vmem:[%s471_s4] ss:$0 sm:$0xff]  ;;  %s272_s4 = sshll.u32 %s367_s3, 4  ;;  %s273_s4 = int_to_ptr.vmem [resolvable:$true] %s272_s4 }
   0xa   :  { %321 = vmatprep.subr.bf16.mxu0 %v365_v1  ;;  %s341_s8 = scalar_lea.vmem %s273_s4, 64  ;;  %p346_p1 = scmp.lt.s32.totalorder %s273_s4, %s273_s4 }
   0xb   :  { %vm239_vm4 = vcmp.ge.s32.totalorder %v224_v23, 8  ;;  %vm240_vm5 = vcmp.lt.s32.totalorder %v224_v23, 12  ;;  %vm226_vm7 = vcmp.lt.s32.totalorder %v224_v23, 3  ;;  %vm232_vm8 = vcmp.ge.s32.totalorder %v224_v23, 3  ;;  %p342_p0 = scmp.ne.s32.totalorder %s273_s4, %s341_s8  ;;  %p347_p2 = scmp.lt.s32.totalorder %s341_s8, %s341_s8 }
   0xc   :  { %312 = vmatpush3.bf16.msra.mxu1 %v333_v6  ;;  %vm426_vm6 = vmand %vm239_vm4, %vm240_vm5  ;;  %vm233_vm9 = vcmp.lt.s32.totalorder %v224_v23, 8 }
   0xd   :  { %313 = vmatprep.subr.bf16.mxu1 %v365_v1  ;;  %322 = vmatpush3.bf16.msra.mxu0 %v336_v15  ;;  %vm433_vm10 = vmand %vm232_vm8, %vm233_vm9  ;;  %p348_p3 = por %p347_p2, %p346_p1 }
   0xf   :  { %p349_p4 = pnand %p348_p3, %p342_p0 }
  0x10   :  { %314 = vmatpush3.bf16.msra.mxu1 %v334_v7 }
  0xd8   :  { %v70_v9 = vpop.f32.mrb[0].mxu0 }
  0xd9   :  { %v76_v10 = vmax.f32 %v70_v9, 0.0  ;;  %v305_v11 = vpop.f32.mrb[1].mxu0 }
  0xda   :  { %v73_v12 = vpop.f32.mrb[2].mxu0 }
  0xdb   :  { %v77_v13 = vpack.c.bf16 %v76_v10, %v76_v10  ;;  %v306_v14 = vpop.f32.mrb[3].mxu0 }
  0xdd   :  { %316 = vmatmul.mubr.msk.bf16.vlgmr.msra.gmra.mrb[0].mxu1 %vm110_vm2, %v77_v13 }
 0x1b0   :  { %v148_v16 = vpop.f32.mrb[0].mxu1 }
 0x1b1   :  { %v154_v17 = vmax.f32 %v148_v16, 0.0  ;;  %v317_v18 = vpop.f32.mrb[1].mxu1 }
 0x1b2   :  { %v151_v19 = vpop.f32.mrb[2].mxu1 }
 0x1b3   :  { %v155_v20 = vpack.c.bf16 %v154_v17, %v154_v17  ;;  %v318_v21 = vpop.f32.mrb[3].mxu1 }
 0x1b5   :  { %324 = vmatmul.mubr.msk.bf16.vlgmr.msra.gmra.mrb[4].mxu0 %vm179_vm3, %v155_v20 }
 0x288   :  { %v217_v25 = vpop.f32.mrb[4].mxu0 }
 0x289   :  { %v218_v27 = vadd.f32 %v287_v24, %v217_v25  ;;  %v325_v28 = vpop.f32.mrb[5].mxu0 }
 0x28a   :  { %v220_v29 = vpop.f32.mrb[6].mxu0 }
 0x28b   :  { %v326_v30 = vpop.f32.mrb[7].mxu0  ;;  %v242_v31 = vsel %vm426_vm6, %v218_v27, -inf  ;;  %v228_v32 = vsel %vm226_vm7, %v218_v27, -inf  ;;  %v235_v34 = vsel %vm433_vm10, %v218_v27, -inf }
 0x28c   :  { %243 = vmax.xlane.f32.xlu1 %v242_v31  ;;  %229 = vmax.xlane.f32.xlu0 %v228_v32 }
 0x290   :  { %236 = vmax.xlane.f32.xlu0 %v235_v34 }
 0x319   :  { %v230_v35 = vpop.xlane.xlu0 %229  ;;  %v244_v38 = vpop.xlane.xlu1 %243 }
 0x31a   :  { %v231_v36 = vsel %vm226_vm7, %v230_v35, %v218_v27 }
 0x31d   :  { %v237_v37 = vpop.xlane.xlu0 %236 }
 0x31e   :  { %v238_v39 = vsel %vm433_vm10, %v237_v37, %v231_v36 }
 0x31f   :  { %v245_v40 = vsel %vm426_vm6, %v244_v38, %v238_v39 }
 0x320   :  { %v246_v41 = vsub.f32 %v218_v27, %v245_v40 }
 0x322   :  { %v247_v42 = vmul.f32 1.442695, %v246_v41 }
 0x324   :  { %337 = vpow2.f32 %v247_v42 }
 0x32e   :  { %v338_v43 = vpop.eup %337 }
 0x32f   :  { %v253_v44 = vsel %vm433_vm10, %v338_v43, 0.0  ;;  %v249_v45 = vsel %vm226_vm7, %v338_v43, 0.0  ;;  %v257_v46 = vsel %vm426_vm6, %v338_v43, 0.0 }
 0x330   :  { %254 = vadd.xlane.f32.xlu0 %v253_v44  ;;  %250 = vadd.xlane.f32.xlu1 %v249_v45 }
 0x334   :  { %258 = vadd.xlane.f32.xlu1 %v257_v46 }
 0x3bd   :  { %v251_v47 = vpop.xlane.xlu1 %250  ;;  %v255_v48 = vpop.xlane.xlu0 %254 }
 0x3be   :  { %v252_v49 = vsel %vm226_vm7, %v251_v47, 1.0 }
 0x3bf   :  { %v256_v50 = vsel %vm433_vm10, %v255_v48, %v252_v49 }
 0x3c1   :  { %v259_v51 = vpop.xlane.xlu1 %258 }
 0x3c2   :  { %v260_v52 = vsel %vm426_vm6, %v259_v51, %v256_v50 }
 0x3c3   :  { %339 = vrcp.f32 %v260_v52 }
 0x3cd   :  { %v340_v53 = vpop.eup %339 }
 0x3ce   :  { %v262_v54 = vmul.f32 %v340_v53, %v338_v43 }
 0x3d0   :  { %v263_v55 = vsel %vm240_vm5, %v262_v54, 0.0 }
 0x3d1   :  { %v264_v56 = vpack.c.bf16 %v263_v55, %v263_v55 }
 0x3d3   :  { %265 = vst [vmem:[#allocation2] sm:$0xf] %v264_v56 }
 0x3d4   :  { %352 = shalt.err (!%p349_p4)
}
 0x3d5   :  { %s353_s11 = scalar_lea.hbm %s472_s5, 64 }
 0x3d6   :  { %p354_p5 = scmp.ne.s32.totalorder %s472_s5, %s353_s11  ;;  %p357_p6 = scmp.lt.u32.totalorder %s353_s11, %s472_s5 }
 0x3d8   :  { %p359_p7 = pnand %p357_p6, %p354_p5 }
 0x3da   :  { %362 = shalt.err (!%p359_p7)
}
 0x3db   :  { %275 = dma.vmem_to_hbm [thread:$0]  %s273_s4, 64, %s472_s5, [#allocation3]  }
 0x3dc   :  { %363 = dma.done.wait [#allocation3], 64  }
 0x3dd   :  { %364 = vsyncadd [#allocation3], 4294967232 }
 0x3de   :  { %279 = vsyncpa [#allocation3], 1 }

</bundles_post_ra>
